<compile_context>
chip_gen: v5e
topology: v5e:2x2
jax: 0.10.0
libtpu: 0.0.40
codegen_flags: <defaults>
</compile_context>

<pallas_src>
import jax
import jax.numpy as jnp
from jax.experimental import pallas as pl
from jax.experimental.pallas import tpu as pltpu


def _round_up(n: int, m: int) -> int:
    return ((n + m - 1) // m) * m


def _nonneg_net_kernel(x_ref, w1e_ref, b1e_ref, w2e_ref, b2e_ref, o_ref):
    # x_ref:  (TM, 49)   w1e_ref: (49, 32) = exp(w1).T   b1e_ref: (1, 32) = exp(b1)
    # w2e_ref: (1, 32) = exp(w2)   b2e_ref: (1, 1) = exp(b2)   o_ref: (TM, 1)
    x = x_ref[...]

    # Layer 1 on the MXU: x @ exp(w1.T) + exp(b1)
    h = jnp.dot(x, w1e_ref[...], preferred_element_type=jnp.float32)
    h = h + b1e_ref[...]

    # shiftedReLU(shift=0.5): relu(h - 0.5)
    h = jnp.maximum(h - 0.5, 0.0)

    # Layer 2 as VPU multiply + lane reduction (degenerate N=1 matmul avoided):
    # y = h @ exp(w2.T) + exp(b2)
    y = jnp.sum(h * w2e_ref[...], axis=-1, keepdims=True) + b2e_ref[...]

    # scaledSigmoid(scale=6): 1 / (1 + exp((-y + 6) / 6))
    o_ref[...] = 1.0 / (1.0 + jnp.exp((-y + 6.0) / 6.0))


def nonneg_net_forward(x, w1, b1, w2, b2, *, tile_m: int = 1024):
    """Pallas implementation of NonNegativeNet.forward.

    x : any shape whose element count is divisible by 49 (torch .view(-1, 49))
    w1: (32, 49), b1: (32,), w2: (1, 32), b2: (1,)   (PyTorch parameter shapes)
    returns: (B, 1) float32
    """
    assert x.size % 49 == 0, "input element count must be divisible by 49"
    assert tile_m % 128 == 0, "tile_m must be a multiple of 128"

    xf = x.reshape(-1, 49).astype(jnp.float32)
    B = xf.shape[0]

    # Hoist the grid-invariant exponentials out of the kernel.
    w1e = jnp.exp(jnp.transpose(w1).astype(jnp.float32))      # (49, 32)
    b1e = jnp.exp(b1.astype(jnp.float32)).reshape(1, 32)       # (1, 32)
    w2e = jnp.exp(w2.astype(jnp.float32)).reshape(1, 32)       # (1, 32)
    b2e = jnp.exp(b2.astype(jnp.float32)).reshape(1, 1)        # (1, 1)

    # Batch tile: multiple of 128, capped so double-buffered blocks stay small
    # even under v7x's 64 MiB VMEM / 32 MiB default scoped limit.
    TM = min(tile_m, _round_up(B, 128))
    B_pad = _round_up(B, TM)
    if B_pad != B:
        xf = jnp.pad(xf, ((0, B_pad - B), (0, 0)))
    grid = (B_pad // TM,)

    cost = pl.CostEstimate(
        flops=2 * B_pad * 49 * 32 + 4 * B_pad * 32,
        transcendentals=B_pad,  # one exp per output row (sigmoid)
        bytes_accessed=B_pad * 49 * 4 + B_pad * 4 + (49 * 32 + 32 + 32 + 1) * 4,
    )

    out = pl.pallas_call(
        _nonneg_net_kernel,
        out_shape=jax.ShapeDtypeStruct((B_pad, 1), jnp.float32),
        grid=grid,
        in_specs=[
            pl.BlockSpec((TM, 49), lambda i: (i, 0)),   # x: streamed per tile
            pl.BlockSpec((49, 32), lambda i: (0, 0)),   # exp(w1.T): resident
            pl.BlockSpec((1, 32), lambda i: (0, 0)),    # exp(b1)
            pl.BlockSpec((1, 32), lambda i: (0, 0)),    # exp(w2)
            pl.BlockSpec((1, 1), lambda i: (0, 0)),     # exp(b2)
        ],
        out_specs=pl.BlockSpec((TM, 1), lambda i: (i, 0)),
        compiler_params=pltpu.CompilerParams(
            dimension_semantics=("parallel",),
        ),
        cost_estimate=cost,
    )(xf, w1e, b1e, w2e, b2e)

    return out[:B]


def _reference_forward(x, w1, b1, w2, b2):
    """Pure-JAX reference mirroring the PyTorch module (for self-check)."""
    xf = x.reshape(-1, 49).astype(jnp.float32)
    h = jnp.dot(xf, jnp.exp(w1.T), precision=jax.lax.Precision.HIGHEST) + jnp.exp(b1)
    h = jnp.maximum(h - 0.5, 0.0)
    y = jnp.dot(h, jnp.exp(w2.T), precision=jax.lax.Precision.HIGHEST) + jnp.exp(b2)
    return 1.0 / (1.0 + jnp.exp((-y + 6.0) / 6.0))


if __name__ == "__main__":
    key = jax.random.PRNGKey(0)
    k_x, k_w1, k_b1, k_w2, k_b2, k_x2 = jax.random.split(key, 6)

    # Parameters with the shapes from NonNegativeNet.__init__ (randn init).
    w1 = jax.random.normal(k_w1, (32, 49), dtype=jnp.float32)
    b1 = jax.random.normal(k_b1, (32,), dtype=jnp.float32)
    w2 = jax.random.normal(k_w2, (1, 32), dtype=jnp.float32)
    b2 = jax.random.normal(k_b2, (1,), dtype=jnp.float32)

    # Small input consistent with view(-1, 49): NCHW [2, 1, 7, 7] -> (2, 49).
    x = jax.random.normal(k_x, (2, 1, 7, 7), dtype=jnp.float32)
    out = jax.block_until_ready(nonneg_net_forward(x, w1, b1, w2, b2))
    ref = _reference_forward(x, w1, b1, w2, b2)
    assert out.shape == (2, 1), out.shape
    # Tolerance accounts for MXU f32-emulation vs XLA highest-precision matmul.
    assert jnp.allclose(out, ref, atol=1e-3, rtol=1e-3), (out, ref)

    # Second check: non-multiple batch exercises the grid (3 tiles) + padding.
    x2 = jax.random.normal(k_x2, (300, 49), dtype=jnp.float32)
    out2 = jax.block_until_ready(
        nonneg_net_forward(x2, w1, b1, w2, b2, tile_m=128))
    ref2 = _reference_forward(x2, w1, b1, w2, b2)
    assert out2.shape == (300, 1), out2.shape
    assert jnp.allclose(out2, ref2, atol=1e-3, rtol=1e-3)

    print("KERNEL_OK")
</pallas_src>

<mosaic_0001>
module attributes {stable_mosaic.version = 11 : i64} {
  func.func @_nonneg_net_kernel(%arg0: i32, %arg1: memref<128x49xf32, #tpu.memory_space<vmem>>, %arg2: memref<49x32xf32, #tpu.memory_space<vmem>>, %arg3: memref<1x32xf32, #tpu.memory_space<vmem>>, %arg4: memref<1x32xf32, #tpu.memory_space<vmem>>, %arg5: memref<1x1xf32, #tpu.memory_space<vmem>>, %arg6: memref<128x1xf32, #tpu.memory_space<vmem>>) attributes {dimension_semantics = [#tpu.dimension_semantics<parallel>], iteration_bounds = array<i64: 1>, scalar_prefetch = 0 : i64, scratch_operands = 0 : i64, tpu.core_type = #tpu.core_type<tc>, window_params = [{transform_indices = @transform_0, window_bounds = array<i64: 128, 49>}, {pipeline_mode = #tpu.pipeline_mode<synchronous>, transform_indices = @transform_1, window_bounds = array<i64: 49, 32>}, {pipeline_mode = #tpu.pipeline_mode<synchronous>, transform_indices = @transform_2, window_bounds = array<i64: 1, 32>}, {pipeline_mode = #tpu.pipeline_mode<synchronous>, transform_indices = @transform_3, window_bounds = array<i64: 1, 32>}, {pipeline_mode = #tpu.pipeline_mode<synchronous>, transform_indices = @transform_4, window_bounds = array<i64: 1, 1>}, {transform_indices = @transform_5, window_bounds = array<i64: 128, 1>}]} {
    %c0 = arith.constant 0 : index
    %c0_0 = arith.constant 0 : index
    %0 = vector.load %arg1[%c0, %c0_0] : memref<128x49xf32, #tpu.memory_space<vmem>>, vector<128x49xf32>
    %c0_1 = arith.constant 0 : index
    %c0_2 = arith.constant 0 : index
    %1 = vector.load %arg2[%c0_1, %c0_2] : memref<49x32xf32, #tpu.memory_space<vmem>>, vector<49x32xf32>
    %cst = arith.constant dense<0.000000e+00> : vector<128x32xf32>
    %2 = tpu.matmul %0, %1, %cst {dimension_numbers = #tpu.dot_dimension_numbers<[1], [0], [0], [1], [0, 0, 1, 1], [], []>} : vector<128x49xf32>, vector<49x32xf32>, vector<128x32xf32> -> vector<128x32xf32>
    %c0_3 = arith.constant 0 : index
    %c0_4 = arith.constant 0 : index
    %3 = vector.load %arg3[%c0_3, %c0_4] : memref<1x32xf32, #tpu.memory_space<vmem>>, vector<1x32xf32>
    %4 = vector.broadcast %3 : vector<1x32xf32> to vector<128x32xf32>
    %5 = arith.addf %2, %4 : vector<128x32xf32>
    %cst_5 = arith.constant 5.000000e-01 : f32
    %6 = vector.broadcast %cst_5 : f32 to vector<128x32xf32>
    %7 = arith.subf %5, %6 : vector<128x32xf32>
    %cst_6 = arith.constant 0.000000e+00 : f32
    %8 = vector.broadcast %cst_6 : f32 to vector<128x32xf32>
    %9 = arith.maximumf %7, %8 : vector<128x32xf32>
    %c0_7 = arith.constant 0 : index
    %c0_8 = arith.constant 0 : index
    %10 = vector.load %arg4[%c0_7, %c0_8] : memref<1x32xf32, #tpu.memory_space<vmem>>, vector<1x32xf32>
    %11 = vector.broadcast %10 : vector<1x32xf32> to vector<128x32xf32>
    %12 = arith.mulf %9, %11 : vector<128x32xf32>
    %cst_9 = arith.constant dense<0.000000e+00> : vector<128xf32>
    %13 = vector.multi_reduction <add>, %12, %cst_9 [1] : vector<128x32xf32> to vector<128xf32>
    %14 = vector.shape_cast %13 : vector<128xf32> to vector<128x1xf32>
    %c0_10 = arith.constant 0 : index
    %c0_11 = arith.constant 0 : index
    %15 = vector.load %arg5[%c0_10, %c0_11] : memref<1x1xf32, #tpu.memory_space<vmem>>, vector<1x1xf32>
    %16 = vector.broadcast %15 : vector<1x1xf32> to vector<128x1xf32>
    %17 = arith.addf %14, %16 : vector<128x1xf32>
    %cst_12 = arith.constant 0.000000e+00 : f32
    %18 = vector.broadcast %cst_12 : f32 to vector<128x1xf32>
    %19 = arith.subf %18, %17 : vector<128x1xf32>
    %cst_13 = arith.constant 6.000000e+00 : f32
    %20 = vector.broadcast %cst_13 : f32 to vector<128x1xf32>
    %21 = arith.addf %19, %20 : vector<128x1xf32>
    %cst_14 = arith.constant 6.000000e+00 : f32
    %22 = vector.broadcast %cst_14 : f32 to vector<128x1xf32>
    %23 = arith.divf %21, %22 : vector<128x1xf32>
    %24 = math.exp %23 : vector<128x1xf32>
    %cst_15 = arith.constant 1.000000e+00 : f32
    %25 = vector.broadcast %cst_15 : f32 to vector<128x1xf32>
    %26 = arith.addf %25, %24 : vector<128x1xf32>
    %cst_16 = arith.constant 1.000000e+00 : f32
    %27 = vector.broadcast %cst_16 : f32 to vector<128x1xf32>
    %28 = arith.divf %27, %26 : vector<128x1xf32>
    %c0_17 = arith.constant 0 : index
    %c0_18 = arith.constant 0 : index
    %29 = vector.load %arg6[%c0_17, %c0_18] : memref<128x1xf32, #tpu.memory_space<vmem>>, vector<128x1xf32>
    tpu.vector_store %arg6[%c0_17, %c0_18], %28 {strides = array<i32>} : memref<128x1xf32, #tpu.memory_space<vmem>>, vector<128x1xf32>,
    return
  }
  func.func @transform_0(%arg0: i32) -> (i32, i32) {
    %c0_i32 = arith.constant 0 : i32
    %c0_i32_0 = arith.constant 0 : i32
    return %arg0, %c0_i32 : i32, i32
  }
  func.func @transform_1(%arg0: i32) -> (i32, i32) {
    %c0_i32 = arith.constant 0 : i32
    %c0_i32_0 = arith.constant 0 : i32
    %c0_i32_1 = arith.constant 0 : i32
    return %c0_i32, %c0_i32_0 : i32, i32
  }
  func.func @transform_2(%arg0: i32) -> (i32, i32) {
    %c0_i32 = arith.constant 0 : i32
    %c0_i32_0 = arith.constant 0 : i32
    %c0_i32_1 = arith.constant 0 : i32
    return %c0_i32, %c0_i32_0 : i32, i32
  }
  func.func @transform_3(%arg0: i32) -> (i32, i32) {
    %c0_i32 = arith.constant 0 : i32
    %c0_i32_0 = arith.constant 0 : i32
    %c0_i32_1 = arith.constant 0 : i32
    return %c0_i32, %c0_i32_0 : i32, i32
  }
  func.func @transform_4(%arg0: i32) -> (i32, i32) {
    %c0_i32 = arith.constant 0 : i32
    %c0_i32_0 = arith.constant 0 : i32
    %c0_i32_1 = arith.constant 0 : i32
    return %c0_i32, %c0_i32_0 : i32, i32
  }
  func.func @transform_5(%arg0: i32) -> (i32, i32) {
    %c0_i32 = arith.constant 0 : i32
    %c0_i32_0 = arith.constant 0 : i32
    return %arg0, %c0_i32 : i32, i32
  }
}

</mosaic_0001>

<bundles_post_ra>
// kernel: tpu_custom_call.1
= control target key start
LH: loop header
LB: loop body
LE: loop exit
PB: predicated region body
PF: predicated region fallthrough
CT: control target
= control target key end

     0   :  { %vm98_vm0 = vcmask 1040384   ;;  %vm49_vm1 = vcmask 400384   ;;  %vm219_vm2 = vcmask 261120   ;;  %vm631_vm5 = vcmask 7168   ;;  %s1228_s1 = inlined_call_operand.vmem [shape: f32[49,32], index: 1, kind: input, shape index: {}]   ;;  %s1229_s2 = inlined_call_operand.vmem [shape: f32[1,32], index: 2, kind: input, shape index: {}]   ;;  %s1230_s0 = inlined_call_operand.vmem [shape: f32[128,49], index: 0, kind: input, shape index: {}]   ;;  %s1231_s3 = inlined_call_operand.vmem [shape: f32[1,32], index: 3, kind: input, shape index: {}]   ;;  %s1232_s4 = inlined_call_operand.<no memory space> [shape: f32[1,1], index: 4, kind: input, shape index: {}]   ;;  %s1233_s5 = inlined_call_operand.vmem [shape: f32[128,1], index: 5, kind: output, shape index: {}]  }
   0x1   :  { %v44_v0 = vld [vmem:[%s1228_s1 + $0x30] sm:$0x1]  ;;  %v43_v1 = vld [vmem:[%s1228_s1 + $0x28] sm:$0xff]  ;;  %v42_v2 = vld [vmem:[%s1228_s1 + $0x20] sm:$0xff] }
   0x2   :  { %652 = vmatpush.msk.msra.mxu0 %vm98_vm0, %v44_v0  ;;  %685 = vmatpush.msk.msra.mxu1 %vm98_vm0, %v44_v0  ;;  %v41_v3 = vld [vmem:[%s1228_s1 + $0x18] sm:$0xff]  ;;  %v40_v4 = vld [vmem:[%s1228_s1 + $0x10] sm:$0xff]  ;;  %v39_v5 = vld [vmem:[%s1228_s1 + $0x8] sm:$0xff] }
   0x3   :  { %686 = vmatpush.msk.msra.mxu2 %vm98_vm0, %v44_v0  ;;  %687 = vmatpush.msk.msra.mxu3 %vm98_vm0, %v44_v0  ;;  %v38_v6 = vld [vmem:[%s1228_s1] sm:$0xff]  ;;  %v23_v11 = vld [vmem:[%s1230_s0 + $0x8] sm:$0xff]  ;;  %v24_v15 = vld [vmem:[%s1230_s0 + $0x10] sm:$0xff] }
   0x4   :  { %112 = vmatpush.msra.mxu0 %v43_v1  ;;  %688 = vmatpush.msra.mxu1 %v43_v1  ;;  %v22_v7 = vld [vmem:[%s1230_s0] sm:$0xff]  ;;  %v31_v12 = vld [vmem:[%s1230_s0 + $0x48] sm:$0xff]  ;;  %v32_v16 = vld [vmem:[%s1230_s0 + $0x50] sm:$0xff] }
   0x5   :  { %689 = vmatpush.msra.mxu2 %v43_v1  ;;  %690 = vmatpush.msra.mxu3 %v43_v1  ;;  %v26_v8 = vld [vmem:[%s1230_s0 + $0x20] sm:$0xff]  ;;  %v27_v13 = vld [vmem:[%s1230_s0 + $0x28] sm:$0xff]  ;;  %v28_v17 = vld [vmem:[%s1230_s0 + $0x30] sm:$0xff] }
   0x6   :  { %113 = vmatpush.msra.mxu0 %v42_v2  ;;  %691 = vmatpush.msra.mxu1 %v42_v2  ;;  %v30_v9 = vld [vmem:[%s1230_s0 + $0x40] sm:$0xff]  ;;  %v35_v14 = vld [vmem:[%s1230_s0 + $0x68] sm:$0xff]  ;;  %v36_v18 = vld [vmem:[%s1230_s0 + $0x70] sm:$0xff] }
   0x7   :  { %692 = vmatpush.msra.mxu2 %v42_v2  ;;  %693 = vmatpush.msra.mxu3 %v42_v2  ;;  %v34_v10 = vld [vmem:[%s1230_s0 + $0x60] sm:$0xff]  ;;  %v25_v19 = vld [vmem:[%s1230_s0 + $0x18] sm:$0xff] }
   0x8   :  { %114 = vmatpush.msra.mxu0 %v41_v3  ;;  %694 = vmatpush.msra.mxu1 %v41_v3  ;;  %v33_v20 = vld [vmem:[%s1230_s0 + $0x58] sm:$0xff]  ;;  %v895_v23 = vld [vmem:[%s1229_s2] ss:$0 sm:$0xff] }
   0x9   :  { %695 = vmatpush.msra.mxu2 %v41_v3  ;;  %696 = vmatpush.msra.mxu3 %v41_v3  ;;  %v29_v21 = vld [vmem:[%s1230_s0 + $0x38] sm:$0xff]  ;;  %v902_v29 = vld [vmem:[%s1231_s3] ss:$0 sm:$0xff] }
   0xa   :  { %115 = vmatpush.msra.mxu0 %v40_v4  ;;  %697 = vmatpush.msra.mxu1 %v40_v4  ;;  %v37_v22 = vld [vmem:[%s1230_s0 + $0x78] sm:$0xff] }
   0xb   :  { %698 = vmatpush.msra.mxu2 %v40_v4  ;;  %699 = vmatpush.msra.mxu3 %v40_v4 }
   0xc   :  { %116 = vmatpush.msra.mxu0 %v39_v5  ;;  %700 = vmatpush.msra.mxu1 %v39_v5 }
   0xd   :  { %701 = vmatpush.msra.mxu2 %v39_v5  ;;  %702 = vmatpush.msra.mxu3 %v39_v5 }
   0xe   :  { %117 = vmatpush.msra.mxu0 %v38_v6  ;;  %703 = vmatpush.msra.mxu1 %v38_v6 }
   0xf   :  { %704 = vmatpush.msra.mxu2 %v38_v6  ;;  %653 = vmatmul.msk.f32.vlgmr.msra.gmra.mxu0 %vm49_vm1, %v22_v7 }
  0x10   :  { %657 = vmatmul.msk.f32.vlgmr.msra.gmra.mxu1 %vm49_vm1, %v26_v8  ;;  %661 = vmatmul.msk.f32.vlgmr.msra.gmra.mxu2 %vm49_vm1, %v30_v9 }
  0x11   :  { %705 = vmatpush.msra.mxu3 %v38_v6 }
  0x12   :  { %665 = vmatmul.msk.f32.vlgmr.msra.gmra.mxu3 %vm49_vm1, %v34_v10 }
  0x17   :  { %654 = vmatmul.msk.f32.gmra.mxu0 %vm49_vm1, %v23_v11 }
  0x18   :  { %662 = vmatmul.msk.f32.gmra.mxu2 %vm49_vm1, %v31_v12  ;;  %658 = vmatmul.msk.f32.gmra.mxu1 %vm49_vm1, %v27_v13 }
  0x1a   :  { %666 = vmatmul.msk.f32.gmra.mxu3 %vm49_vm1, %v35_v14 }
  0x1f   :  { %655 = vmatmul.msk.f32.gmra.mxu0 %vm49_vm1, %v24_v15 }
  0x20   :  { %663 = vmatmul.msk.f32.gmra.mxu2 %vm49_vm1, %v32_v16  ;;  %659 = vmatmul.msk.f32.gmra.mxu1 %vm49_vm1, %v28_v17  ;;  %v10_v17 = vstv %s1232_s4 }
  0x21   :  { %11 = vst [vmem:[#allocation2] sm:$0x1] %v10_v17 }
  0x22   :  { %667 = vmatmul.msk.f32.gmra.mxu3 %vm49_vm1, %v36_v18 }
  0x27   :  { %656 = vmatmul.msk.f32.gmra.mxu0 %vm49_vm1, %v25_v19 }
  0x28   :  { %664 = vmatmul.msk.f32.gmra.mxu2 %vm49_vm1, %v33_v20  ;;  %660 = vmatmul.msk.f32.gmra.mxu1 %vm49_vm1, %v29_v21 }
  0x2a   :  { %668 = vmatmul.msk.f32.gmra.mxu3 %vm49_vm1, %v37_v22 }
  0x8c   :  { %v119_v24 = vpop.f32.mrf.mxu0 }
  0x8d   :  { %v120_v25 = vadd.f32 %v895_v23, %v119_v24  ;;  %v131_v26 = vpop.f32.mrf.mxu1 }
  0x8e   :  { %v132_v27 = vadd.f32 %v895_v23, %v131_v26 }
  0x8f   :  { %v669_v28 = vadd.f32 -0.5, %v120_v25 }
  0x90   :  { %v673_v30 = vadd.f32 -0.5, %v132_v27 }
  0x91   :  { %v183_v31 = vmax.f32 %v669_v28, 0.0 }
  0x92   :  { %v187_v32 = vmax.f32 %v673_v30, 0.0 }
  0x93   :  { %v143_v33 = vpop.f32.mrf.mxu2  ;;  %v203_v34 = vmul.f32 %v902_v29, %v183_v31 }
  0x94   :  { %v144_v35 = vadd.f32 %v895_v23, %v143_v33  ;;  %v122_v36 = vpop.f32.mrf.mxu0  ;;  %v207_v37 = vmul.f32 %v902_v29, %v187_v32 }
  0x95   :  { %v123_v38 = vadd.f32 %v895_v23, %v122_v36  ;;  %v155_v39 = vpop.f32.mrf.mxu3  ;;  %v220_v40 = vsel %vm219_vm2, %v203_v34, 0.0  ;;  %v134_v41 = vpop.f32.mrf.mxu1 }
  0x96   :  { %v677_v42 = vadd.f32 -0.5, %v144_v35  ;;  %v156_v43 = vadd.f32 %v895_v23, %v155_v39  ;;  %v232_v44 = vsel %vm219_vm2, %v207_v37, 0.0  ;;  %221 = vadd.xlane.f32.xlu0 %v220_v40  ;;  %v135_v45 = vadd.f32 %v895_v23, %v134_v41 }
  0x97   :  { %233 = vadd.xlane.f32.xlu2 %v232_v44  ;;  %v670_v49 = vadd.f32 -0.5, %v123_v38 }
  0x98   :  { %v191_v46 = vmax.f32 %v677_v42, 0.0  ;;  %v681_v47 = vadd.f32 -0.5, %v156_v43  ;;  %v674_v48 = vadd.f32 -0.5, %v135_v45 }
  0x99   :  { %v184_v59 = vmax.f32 %v670_v49, 0.0 }
  0x9a   :  { %v195_v50 = vmax.f32 %v681_v47, 0.0  ;;  %v211_v51 = vmul.f32 %v902_v29, %v191_v46  ;;  %v188_v54 = vmax.f32 %v674_v48, 0.0 }
  0x9b   :  { %v146_v52 = vpop.f32.mrf.mxu2  ;;  %v204_v3 = vmul.f32 %v902_v29, %v184_v59  ;;  %v776_v59 = vmov 6.0  }
  0x9c   :  { %v125_v53 = vpop.f32.mrf.mxu0  ;;  %v244_v55 = vsel %vm219_vm2, %v211_v51, 0.0  ;;  %v215_v56 = vmul.f32 %v902_v29, %v195_v50  ;;  %v147_v60 = vadd.f32 %v895_v23, %v146_v52  ;;  %v208_v0 = vmul.f32 %v902_v29, %v188_v54 }
  0x9d   :  { %v126_v57 = vadd.f32 %v895_v23, %v125_v53  ;;  %v158_v58 = vpop.f32.mrf.mxu3  ;;  %v137_v62 = vpop.f32.mrf.mxu1  ;;  %v223_v15 = vsel %vm219_vm2, %v204_v3, 0.0  ;;  %710 = vrcp.f32 %v776_v59 }
  0x9e   :  { %v256_v61 = vsel %vm219_vm2, %v215_v56, 0.0  ;;  %v678_v2 = vadd.f32 -0.5, %v147_v60  ;;  %v235_v7 = vsel %vm219_vm2, %v208_v0, 0.0  ;;  %v138_v9 = vadd.f32 %v895_v23, %v137_v62  ;;  %v953_v0 = vld [vmem:[#allocation2] ss:$0 sm:$0xff] }
  0x9f   :  { %v671_v63 = vadd.f32 -0.5, %v126_v57  ;;  %245 = vadd.xlane.f32.xlu2 %v244_v55  ;;  %257 = vadd.xlane.f32.xlu0 %v256_v61  ;;  %v159_v49 = vadd.f32 %v895_v23, %v158_v58 }
  0xa0   :  { %v192_v13 = vmax.f32 %v678_v2, 0.0  ;;  %v675_v19 = vadd.f32 -0.5, %v138_v9 }
  0xa1   :  { %v185_v1 = vmax.f32 %v671_v63, 0.0  ;;  %v682_v53 = vadd.f32 -0.5, %v159_v49 }
  0xa2   :  { %v212_v24 = vmul.f32 %v902_v29, %v192_v13  ;;  %v189_v30 = vmax.f32 %v675_v19, 0.0 }
  0xa3   :  { %v149_v4 = vpop.f32.mrf.mxu2  ;;  %v205_v5 = vmul.f32 %v902_v29, %v185_v1  ;;  %v196_v57 = vmax.f32 %v682_v53, 0.0  ;;  %v711_v60 = vpop.eup %710 }
  0xa4   :  { %v150_v6 = vadd.f32 %v895_v23, %v149_v4  ;;  %v128_v8 = vpop.f32.mrf.mxu0  ;;  %v247_v35 = vsel %vm219_vm2, %v212_v24, 0.0  ;;  %v209_v41 = vmul.f32 %v902_v29, %v189_v30  ;;  %v321_v61 = vmul.f32 6.0, %v711_v60 }
  0xa5   :  { %v226_v10 = vsel %vm219_vm2, %v205_v5, 0.0  ;;  %v129_v11 = vadd.f32 %v895_v23, %v128_v8  ;;  %v161_v12 = vpop.f32.mrf.mxu3  ;;  %v140_v20 = vpop.f32.mrf.mxu1  ;;  %vm325_vm3 = vweird.f32 %v711_v60 }
  0xa6   :  { %v679_v14 = vadd.f32 -0.5, %v150_v6  ;;  %227 = vadd.xlane.f32.xlu1 %v226_v10  ;;  %v162_v21 = vadd.f32 %v895_v23, %v161_v12  ;;  %v141_v27 = vadd.f32 %v895_v23, %v140_v20  ;;  %v238_v48 = vsel %vm219_vm2, %v209_v41, 0.0 }
  0xa7   :  { %236 = vadd.xlane.f32.xlu2 %v235_v7  ;;  %224 = vadd.xlane.f32.xlu0 %v223_v15  ;;  %v672_v16 = vadd.f32 -0.5, %v129_v11  ;;  %v322_v62 = vsub.f32 1.0, %v321_v61 }
  0xa8   :  { %v193_v18 = vmax.f32 %v679_v14, 0.0  ;;  %v683_v34 = vadd.f32 -0.5, %v162_v21  ;;  %v676_v37 = vadd.f32 -0.5, %v141_v27 }
  0xa9   :  { %v186_v26 = vmax.f32 %v672_v16, 0.0  ;;  %v323_v63 = vmul.f32 %v711_v60, %v322_v62 }
  0xaa   :  { %v213_v22 = vmul.f32 %v902_v29, %v193_v18  ;;  %v197_v42 = vmax.f32 %v683_v34, 0.0  ;;  %v190_v44 = vmax.f32 %v676_v37, 0.0 }
  0xab   :  { %v152_v25 = vpop.f32.mrf.mxu2  ;;  %v206_v38 = vmul.f32 %v902_v29, %v186_v26  ;;  %v324_v1 = vadd.f32 %v711_v60, %v323_v63 }
  0xac   :  { %v153_v28 = vadd.f32 %v895_v23, %v152_v25  ;;  %v250_v31 = vsel %vm219_vm2, %v213_v22, 0.0  ;;  %v217_v50 = vmul.f32 %v902_v29, %v197_v42  ;;  %v210_v51 = vmul.f32 %v902_v29, %v190_v44 }
  0xad   :  { %v164_v32 = vpop.f32.mrf.mxu3  ;;  %v229_v45 = vsel %vm219_vm2, %v206_v38, 0.0  ;;  %v957_v6 = vsel %vm325_vm3, %v711_v60, %v324_v1 }
  0xae   :  { %v680_v33 = vadd.f32 -0.5, %v153_v28  ;;  %251 = vadd.xlane.f32.xlu1 %v250_v31  ;;  %v165_v36 = vadd.f32 %v895_v23, %v164_v32  ;;  %v262_v54 = vsel %vm219_vm2, %v217_v50, 0.0  ;;  %v241_v55 = vsel %vm219_vm2, %v210_v51, 0.0 }
  0xaf   :  { %248 = vadd.xlane.f32.xlu0 %v247_v35  ;;  %v216_v23 = vmul.f32 %v902_v29, %v196_v57 }
  0xb0   :  { %v194_v39 = vmax.f32 %v680_v33, 0.0  ;;  %v684_v40 = vadd.f32 -0.5, %v165_v36 }
  0xb1   :  { %v259_v58 = vsel %vm219_vm2, %v216_v23, 0.0 }
  0xb2   :  { %v214_v43 = vmul.f32 %v902_v29, %v194_v39  ;;  %v198_v46 = vmax.f32 %v684_v40, 0.0 }
  0xb4   :  { %v253_v47 = vsel %vm219_vm2, %v214_v43, 0.0  ;;  %v218_v52 = vmul.f32 %v902_v29, %v198_v46 }
  0xb5   :  { %254 = vadd.xlane.f32.xlu2 %v253_v47 }
  0xb6   :  { %230 = vadd.xlane.f32.xlu1 %v229_v45  ;;  %v265_v56 = vsel %vm219_vm2, %v218_v52, 0.0 }
  0xb7   :  { %239 = vadd.xlane.f32.xlu0 %v238_v48 }
  0xbd   :  { %263 = vadd.xlane.f32.xlu2 %v262_v54 }
  0xbe   :  { %242 = vadd.xlane.f32.xlu1 %v241_v55 }
  0xbf   :  { %266 = vadd.xlane.f32.xlu0 %v265_v56 }
  0xc6   :  { %260 = vadd.xlane.f32.xlu1 %v259_v58 }
 0x109   :  { %v222_v2 = vpop.xlane.xlu0 %221 }
 0x10a   :  { %v234_v3 = vpop.xlane.xlu2 %233  ;;  %v272_v4 = vadd.f32 %v953_v0, %v222_v2 }
 0x10b   :  { %v276_v5 = vadd.f32 %v953_v0, %v234_v3 }
 0x10c   :  { %v288_v29 = vsub.f32 0.0, %v272_v4 }
 0x10d   :  { %v292_v7 = vsub.f32 0.0, %v276_v5 }
 0x10e   :  { %v304_v8 = vadd.f32 6.0, %v288_v29 }
 0x10f   :  { %v308_v9 = vadd.f32 6.0, %v292_v7 }
 0x110   :  { %v327_v10 = vmul.f32 %v957_v6, %v304_v8 }
 0x111   :  { %v331_v11 = vmul.f32 %v957_v6, %v308_v9 }
 0x112   :  { %v343_v12 = vmul.f32 1.442695, %v327_v10  ;;  %v246_v13 = vpop.xlane.xlu2 %245  ;;  %v258_v14 = vpop.xlane.xlu0 %257 }
 0x113   :  { %v351_v15 = vmul.f32 1.442695, %v331_v11  ;;  %v280_v16 = vadd.f32 %v953_v0, %v246_v13  ;;  %v284_v17 = vadd.f32 %v953_v0, %v258_v14 }
 0x114   :  { %712 = vpow2.f32 %v343_v12 }
 0x115   :  { %714 = vpow2.f32 %v351_v15  ;;  %v296_v18 = vsub.f32 0.0, %v280_v16  ;;  %v300_v19 = vsub.f32 0.0, %v284_v17 }
 0x117   :  { %v312_v20 = vadd.f32 6.0, %v296_v18  ;;  %v316_v21 = vadd.f32 6.0, %v300_v19 }
 0x119   :  { %v335_v22 = vmul.f32 %v957_v6, %v312_v20  ;;  %v339_v24 = vmul.f32 %v957_v6, %v316_v21  ;;  %v228_v25 = vpop.xlane.xlu1 %227 }
 0x11a   :  { %v713_v26 = vpop.eup %712  ;;  %v237_v27 = vpop.xlane.xlu2 %236  ;;  %v274_v28 = vadd.f32 %v953_v0, %v228_v25 }
 0x11b   :  { %v225_v30 = vpop.xlane.xlu0 %224  ;;  %v715_v31 = vpop.eup %714  ;;  %v966_v32 = vadd.f32 1.0, %v713_v26  ;;  %v359_v33 = vmul.f32 1.442695, %v335_v22  ;;  %v277_v34 = vadd.f32 %v953_v0, %v237_v27  ;;  %v367_v36 = vmul.f32 1.442695, %v339_v24 }
 0x11c   :  { %v379_v35 = vadd.f32 1.0, %v715_v31  ;;  %v290_v37 = vsub.f32 0.0, %v274_v28  ;;  %v273_v38 = vadd.f32 %v953_v0, %v225_v30 }
 0x11d   :  { %716 = vrcp.f32 %v966_v32  ;;  %v293_v39 = vsub.f32 0.0, %v277_v34  ;;  %vm396_vm4 = vweird.f32 %v966_v32  ;;  %v402_v44 = vand.u32 2147483648, %v966_v32 }
 0x11e   :  { %718 = vrcp.f32 %v379_v35  ;;  %v306_v40 = vadd.f32 6.0, %v290_v37  ;;  %v289_v42 = vsub.f32 0.0, %v273_v38  ;;  %vm456_vm6 = vweird.f32 %v379_v35 }
 0x11f   :  { %720 = vpow2.f32 %v359_v33  ;;  %v309_v41 = vadd.f32 6.0, %v293_v39  ;;  %v460_v48 = vand.u32 2147483647, %v379_v35  ;;  %v462_v52 = vand.u32 2147483648, %v379_v35 }
 0x120   :  { %722 = vpow2.f32 %v367_v36  ;;  %v329_v45 = vmul.f32 %v957_v6, %v306_v40  ;;  %v305_v50 = vadd.f32 6.0, %v289_v42  ;;  %v400_v5 = vand.u32 2147483647, %v966_v32 }
 0x121   :  { %v252_v43 = vpop.xlane.xlu1 %251  ;;  %v332_v49 = vmul.f32 %v957_v6, %v309_v41  ;;  %v403_v7 = vor.u32 1.1754944e-38, %v402_v44  ;;  %vm992_vm10 = vcmp.eq.f32.partialorder %v460_v48, 8.507059e+37  ;;  %v463_v11 = vor.u32 1.1754944e-38, %v462_v52 }
 0x122   :  { %v282_v46 = vadd.f32 %v953_v0, %v252_v43  ;;  %v347_v54 = vmul.f32 1.442695, %v329_v45  ;;  %v328_v58 = vmul.f32 %v957_v6, %v305_v50  ;;  %vm401_vm12 = vcmp.eq.f32.partialorder %v400_v5, 8.507059e+37 }
 0x123   :  { %v717_v47 = vpop.eup %716  ;;  %v353_v23 = vmul.f32 1.442695, %v332_v49  ;;  %v249_v63 = vpop.xlane.xlu0 %248 }
 0x124   :  { %v719_v51 = vpop.eup %718  ;;  %v392_v53 = vmul.f32 %v717_v47, %v966_v32  ;;  %v298_v55 = vsub.f32 0.0, %v282_v46  ;;  %724 = vpow2.f32 %v347_v54  ;;  %v345_v3 = vmul.f32 1.442695, %v328_v58 }
 0x125   :  { %v721_v56 = vpop.eup %720  ;;  %v452_v57 = vmul.f32 %v719_v51, %v379_v35  ;;  %vm457_vm7 = vweird.f32 %v719_v51  ;;  %726 = vpow2.f32 %v353_v23  ;;  %vm397_vm8 = vweird.f32 %v717_v47 }
 0x126   :  { %v723_v59 = vpop.eup %722  ;;  %v393_v60 = vsub.f32 1.0, %v392_v53  ;;  %v978_v61 = vadd.f32 1.0, %v721_v56  ;;  %v314_v62 = vadd.f32 6.0, %v298_v55  ;;  %v281_v8 = vadd.f32 %v953_v0, %v249_v63  ;;  %vm988_vm9 = vmor %vm456_vm6, %vm457_vm7 }
 0x127   :  { %v453_v1 = vsub.f32 1.0, %v452_v57  ;;  %v980_v2 = vadd.f32 1.0, %v723_v59  ;;  %vm398_vm11 = vmor %vm396_vm4, %vm397_vm8 }
 0x128   :  { %v394_v4 = vmul.f32 %v717_v47, %v393_v60  ;;  %728 = vrcp.f32 %v978_v61  ;;  %v520_v13 = vand.u32 2147483647, %v978_v61  ;;  %v522_v15 = vand.u32 2147483648, %v978_v61  ;;  %v255_v32 = vpop.xlane.xlu2 %254 }
 0x129   :  { %v454_v29 = vmul.f32 %v719_v51, %v453_v1  ;;  %730 = vrcp.f32 %v980_v2  ;;  %v337_v16 = vmul.f32 %v957_v6, %v314_v62  ;;  %v580_v19 = vand.u32 2147483647, %v980_v2  ;;  %v231_v52 = vpop.xlane.xlu1 %230 }
 0x12a   :  { %v395_v12 = vadd.f32 %v717_v47, %v394_v4  ;;  %732 = vpow2.f32 %v345_v3  ;;  %v725_v17 = vpop.eup %724  ;;  %v582_v20 = vand.u32 2147483648, %v980_v2  ;;  %vm516_vm13 = vweird.f32 %v978_v61 }
 0x12b   :  { %v455_v14 = vadd.f32 %v719_v51, %v454_v29  ;;  %v727_v21 = vpop.eup %726  ;;  %v1006_v25 = vadd.f32 1.0, %v725_v17  ;;  %v297_v26 = vsub.f32 0.0, %v281_v8  ;;  %vm576_vm14 = vweird.f32 %v980_v2  ;;  %v240_v53 = vpop.xlane.xlu0 %239 }
 0x12c   :  { %v399_v18 = vsel %vm398_vm11, %v717_v47, %v395_v12  ;;  %v1015_v30 = vadd.f32 1.0, %v727_v21  ;;  %v363_v31 = vmul.f32 1.442695, %v337_v16  ;;  %vm1022_vm15 = vcmp.eq.f32.partialorder %v520_v13, 8.507059e+37 }
 0x12d   :  { %v459_v22 = vsel %vm988_vm9, %v719_v51, %v455_v14  ;;  %v404_v24 = vsel %vm401_vm12, %v403_v7, %v399_v18  ;;  %v523_v36 = vor.u32 1.1754944e-38, %v522_v15  ;;  %734 = vrcp.f32 %v1006_v25 }
 0x12e   :  { %v729_v27 = vpop.eup %728  ;;  %v464_v28 = vsel %vm992_vm10, %v463_v11, %v459_v22  ;;  %632 = vst.msk [vmem:[%s1233_s5] sm:$0xff] %vm631_vm5, %v404_v24  ;;  %vm1028_vm0 = vcmp.eq.f32.partialorder %v580_v19, 8.507059e+37  ;;  %v583_v39 = vor.u32 1.1754944e-38, %v582_v20  ;;  %736 = vrcp.f32 %v1015_v30 }
 0x12f   :  { %v731_v33 = vpop.eup %730  ;;  %636 = vst.msk [vmem:[%s1233_s5 + $0x20] sm:$0xff] %vm631_vm5, %v464_v28  ;;  %v512_v34 = vmul.f32 %v729_v27, %v978_v61  ;;  %v477_v42 = vand.u32 2147483648, %v1015_v30  ;;  %v313_v43 = vadd.f32 6.0, %v297_v26  ;;  %v283_v44 = vadd.f32 %v953_v0, %v255_v32 }
 0x130   :  { %v572_v37 = vmul.f32 %v731_v33, %v980_v2  ;;  %v733_v40 = vpop.eup %732  ;;  %v430_v46 = vand.u32 2147483647, %v1006_v25  ;;  %738 = vpow2.f32 %v363_v31  ;;  %vm517_vm1 = vweird.f32 %v729_v27 }
 0x131   :  { %v513_v41 = vsub.f32 1.0, %v512_v34  ;;  %v1036_v47 = vadd.f32 1.0, %v733_v40  ;;  %v475_v49 = vand.u32 2147483647, %v1015_v30  ;;  %v432_v50 = vand.u32 2147483648, %v1006_v25  ;;  %vm518_vm6 = vmor %vm516_vm13, %vm517_vm1 }
 0x132   :  { %v573_v45 = vsub.f32 1.0, %v572_v37  ;;  %vm577_vm2 = vweird.f32 %v731_v33  ;;  %vm426_vm3 = vweird.f32 %v1006_v25  ;;  %vm471_vm4 = vweird.f32 %v1015_v30 }
 0x133   :  { %v514_v48 = vmul.f32 %v729_v27, %v513_v41  ;;  %740 = vrcp.f32 %v1036_v47  ;;  %v735_v54 = vpop.eup %734  ;;  %v478_v56 = vor.u32 1.1754944e-38, %v477_v42  ;;  %v336_v57 = vmul.f32 %v957_v6, %v313_v43  ;;  %vm578_vm8 = vmor %vm576_vm14, %vm577_vm2  ;;  %v267_v34 = vpop.xlane.xlu0 %266 }
 0x134   :  { %v574_v51 = vmul.f32 %v731_v33, %v573_v45  ;;  %v737_v23 = vpop.eup %736  ;;  %v422_v59 = vmul.f32 %v735_v54, %v1006_v25  ;;  %vm1048_vm7 = vcmp.eq.f32.partialorder %v430_v46, 8.507059e+37  ;;  %v299_v62 = vsub.f32 0.0, %v283_v44 }
 0x135   :  { %v515_v55 = vadd.f32 %v729_v27, %v514_v48  ;;  %v467_v1 = vmul.f32 %v737_v23, %v1015_v30  ;;  %vm1056_vm9 = vcmp.eq.f32.partialorder %v475_v49, 8.507059e+37  ;;  %v433_v61 = vor.u32 1.1754944e-38, %v432_v50 }
 0x136   :  { %v575_v58 = vadd.f32 %v731_v33, %v574_v51  ;;  %v415_v4 = vand.u32 2147483647, %v1036_v47  ;;  %v739_v5 = vpop.eup %738  ;;  %v423_v8 = vsub.f32 1.0, %v422_v59  ;;  %v417_v9 = vand.u32 2147483648, %v1036_v47 }
 0x137   :  { %v519_v63 = vsel %vm518_vm6, %v729_v27, %v515_v55  ;;  %v468_v10 = vsub.f32 1.0, %v467_v1  ;;  %v1070_v11 = vadd.f32 1.0, %v739_v5  ;;  %v361_v12 = vmul.f32 1.442695, %v336_v57  ;;  %v264_v27 = vpop.xlane.xlu2 %263 }
 0x138   :  { %v524_v29 = vsel %vm1022_vm15, %v523_v36, %v519_v63  ;;  %v579_v7 = vsel %vm578_vm8, %v731_v33, %v575_v58  ;;  %v424_v14 = vmul.f32 %v735_v54, %v423_v8  ;;  %vm427_vm10 = vweird.f32 %v735_v54  ;;  %v243_v33 = vpop.xlane.xlu1 %242 }
 0x139   :  { %640 = vst.msk [vmem:[%s1233_s5 + $0x40] sm:$0xff] %vm631_vm5, %v524_v29  ;;  %v584_v2 = vsel %vm1028_vm0, %v583_v39, %v579_v7  ;;  %v741_v13 = vpop.eup %740  ;;  %v315_v15 = vadd.f32 6.0, %v299_v62  ;;  %v275_v16 = vadd.f32 %v953_v0, %v231_v52  ;;  %v469_v17 = vmul.f32 %v737_v23, %v468_v10  ;;  %vm428_vm14 = vmor %vm426_vm3, %vm427_vm10 }
 0x13a   :  { %644 = vst.msk [vmem:[%s1233_s5 + $0x60] sm:$0xff] %vm631_vm5, %v584_v2  ;;  %vm472_vm11 = vweird.f32 %v737_v23  ;;  %v407_v18 = vmul.f32 %v741_v13, %v1036_v47  ;;  %742 = vrcp.f32 %v1070_v11  ;;  %v425_v19 = vadd.f32 %v735_v54, %v424_v14 }
 0x13b   :  { %vm411_vm12 = vweird.f32 %v1036_v47  ;;  %vm1080_vm13 = vcmp.eq.f32.partialorder %v415_v4, 8.507059e+37  ;;  %v278_v21 = vadd.f32 %v953_v0, %v240_v53  ;;  %v470_v22 = vadd.f32 %v737_v23, %v469_v17  ;;  %vm473_vm15 = vmor %vm471_vm4, %vm472_vm11 }
 0x13c   :  { %v408_v24 = vsub.f32 1.0, %v407_v18  ;;  %744 = vpow2.f32 %v361_v12  ;;  %v338_v26 = vmul.f32 %v957_v6, %v315_v15  ;;  %v429_v28 = vsel %vm428_vm14, %v735_v54, %v425_v19 }
 0x13d   :  { %vm412_vm0 = vweird.f32 %v741_v13  ;;  %v418_v31 = vor.u32 1.1754944e-38, %v417_v9  ;;  %v291_v32 = vsub.f32 0.0, %v275_v16  ;;  %v474_v35 = vsel %vm473_vm15, %v737_v23, %v470_v22 }
 0x13e   :  { %v434_v36 = vsel %vm1048_vm7, %v433_v61, %v429_v28  ;;  %v409_v25 = vmul.f32 %v741_v13, %v408_v24  ;;  %v365_v37 = vmul.f32 1.442695, %v338_v26  ;;  %v479_v38 = vsel %vm1056_vm9, %v478_v56, %v474_v35  ;;  %vm413_vm1 = vmor %vm411_vm12, %vm412_vm0 }
 0x13f   :  { %634 = vst.msk [vmem:[%s1233_s5 + $0x10] sm:$0xff] %vm631_vm5, %v434_v36  ;;  %v307_v30 = vadd.f32 6.0, %v291_v32  ;;  %v294_v39 = vsub.f32 0.0, %v278_v21  ;;  %v286_v40 = vadd.f32 %v953_v0, %v264_v27  ;;  %v279_v43 = vadd.f32 %v953_v0, %v243_v33 }
 0x140   :  { %v743_v41 = vpop.eup %742  ;;  %637 = vst.msk [vmem:[%s1233_s5 + $0x28] sm:$0xff] %vm631_vm5, %v479_v38  ;;  %v410_v42 = vadd.f32 %v741_v13, %v409_v25  ;;  %746 = vpow2.f32 %v365_v37  ;;  %v287_v44 = vadd.f32 %v953_v0, %v267_v34  ;;  %v552_v46 = vand.u32 2147483648, %v1070_v11  ;;  %v261_v16 = vpop.xlane.xlu1 %260 }
 0x141   :  { %v542_v45 = vmul.f32 %v743_v41, %v1070_v11  ;;  %v330_v48 = vmul.f32 %v957_v6, %v307_v30  ;;  %v310_v49 = vadd.f32 6.0, %v294_v39  ;;  %v302_v52 = vsub.f32 0.0, %v286_v40 }
 0x142   :  { %v745_v50 = vpop.eup %744  ;;  %v414_v51 = vsel %vm413_vm1, %v741_v13, %v410_v42  ;;  %v295_v53 = vsub.f32 0.0, %v279_v43  ;;  %v303_v54 = vsub.f32 0.0, %v287_v44  ;;  %vm547_vm2 = vweird.f32 %v743_v41 }
 0x143   :  { %v419_v55 = vsel %vm1080_vm13, %v418_v31, %v414_v51  ;;  %v543_v56 = vsub.f32 1.0, %v542_v45  ;;  %v384_v57 = vadd.f32 1.0, %v745_v50  ;;  %v349_v23 = vmul.f32 1.442695, %v330_v48 }
 0x144   :  { %633 = vst.msk [vmem:[%s1233_s5 + $0x8] sm:$0xff] %vm631_vm5, %v419_v55  ;;  %v333_v47 = vmul.f32 %v957_v6, %v310_v49  ;;  %v318_v58 = vadd.f32 6.0, %v302_v52  ;;  %v311_v59 = vadd.f32 6.0, %v295_v53  ;;  %v319_v60 = vadd.f32 6.0, %v303_v54 }
 0x145   :  { %v544_v62 = vmul.f32 %v743_v41, %v543_v56  ;;  %v550_v63 = vand.u32 2147483647, %v1070_v11  ;;  %748 = vrcp.f32 %v384_v57  ;;  %vm546_vm3 = vweird.f32 %v1070_v11 }
 0x146   :  { %v747_v1 = vpop.eup %746  ;;  %750 = vpow2.f32 %v349_v23  ;;  %v355_v3 = vmul.f32 1.442695, %v333_v47  ;;  %v341_v61 = vmul.f32 %v957_v6, %v318_v58  ;;  %v334_v29 = vmul.f32 %v957_v6, %v311_v59  ;;  %vm548_vm4 = vmor %vm546_vm3, %vm547_vm2 }
 0x147   :  { %v545_v4 = vadd.f32 %v743_v41, %v544_v62  ;;  %v386_v5 = vadd.f32 1.0, %v747_v1  ;;  %v553_v7 = vor.u32 1.1754944e-38, %v552_v46  ;;  %v342_v9 = vmul.f32 %v957_v6, %v319_v60 }
 0x148   :  { %752 = vpow2.f32 %v355_v3  ;;  %v371_v8 = vmul.f32 1.442695, %v341_v61  ;;  %vm551_vm6 = vcmp.eq.f32.partialorder %v550_v63, 8.507059e+37  ;;  %v357_v12 = vmul.f32 1.442695, %v334_v29 }
 0x149   :  { %v549_v2 = vsel %vm548_vm4, %v743_v41, %v545_v4  ;;  %754 = vrcp.f32 %v386_v5  ;;  %v373_v11 = vmul.f32 1.442695, %v342_v9  ;;  %v535_v17 = vand.u32 2147483647, %v384_v57 }
 0x14a   :  { %v554_v10 = vsel %vm551_vm6, %v553_v7, %v549_v2  ;;  %756 = vpow2.f32 %v371_v8  ;;  %v537_v18 = vand.u32 2147483648, %v384_v57  ;;  %vm531_vm7 = vweird.f32 %v384_v57 }
 0x14b   :  { %v749_v13 = vpop.eup %748  ;;  %642 = vst.msk [vmem:[%s1233_s5 + $0x50] sm:$0xff] %vm631_vm5, %v554_v10  ;;  %758 = vpow2.f32 %v357_v12  ;;  %v285_v24 = vadd.f32 %v953_v0, %v261_v16  ;;  %vm1133_vm9 = vcmp.eq.f32.partialorder %v535_v17, 8.507059e+37  ;;  %v565_v34 = vand.u32 2147483647, %v386_v5 }
 0x14c   :  { %v751_v14 = vpop.eup %750  ;;  %v527_v15 = vmul.f32 %v749_v13, %v384_v57  ;;  %760 = vpow2.f32 %v373_v11  ;;  %vm532_vm8 = vweird.f32 %v749_v13  ;;  %v538_v33 = vor.u32 1.1754944e-38, %v537_v18 }
 0x14d   :  { %v1127_v19 = vadd.f32 1.0, %v751_v14  ;;  %v567_v38 = vand.u32 2147483648, %v386_v5  ;;  %vm533_vm10 = vmor %vm531_vm7, %vm532_vm8  ;;  %vm561_vm11 = vweird.f32 %v386_v5  ;;  %v301_v42 = vsub.f32 0.0, %v285_v24 }
 0x14e   :  { %v753_v20 = vpop.eup %752  ;;  %v528_v21 = vsub.f32 1.0, %v527_v15  ;;  %vm566_vm13 = vcmp.eq.f32.partialorder %v565_v34, 8.507059e+37 }
 0x14f   :  { %v755_v22 = vpop.eup %754  ;;  %762 = vrcp.f32 %v1127_v19  ;;  %v1131_v31 = vadd.f32 1.0, %v753_v20  ;;  %v445_v0 = vand.u32 2147483647, %v1127_v19  ;;  %v447_v30 = vand.u32 2147483648, %v1127_v19 }
 0x150   :  { %v757_v26 = vpop.eup %756  ;;  %v529_v27 = vmul.f32 %v749_v13, %v528_v21  ;;  %v557_v28 = vmul.f32 %v755_v22, %v386_v5  ;;  %vm562_vm12 = vweird.f32 %v755_v22  ;;  %v568_v48 = vor.u32 1.1754944e-38, %v567_v38 }
 0x151   :  { %v1137_v35 = vadd.f32 1.0, %v757_v26  ;;  %v759_v36 = vpop.eup %758  ;;  %764 = vrcp.f32 %v1131_v31  ;;  %vm563_vm14 = vmor %vm561_vm11, %vm562_vm12  ;;  %vm441_vm15 = vweird.f32 %v1127_v19  ;;  %vm1155_vm0 = vcmp.eq.f32.partialorder %v445_v0, 8.507059e+37 }
 0x152   :  { %v530_v25 = vadd.f32 %v749_v13, %v529_v27  ;;  %v558_v37 = vsub.f32 1.0, %v557_v28  ;;  %v761_v39 = vpop.eup %760  ;;  %v1146_v45 = vadd.f32 1.0, %v759_v36  ;;  %v448_v51 = vor.u32 1.1754944e-38, %v447_v30 }
 0x153   :  { %766 = vrcp.f32 %v1137_v35  ;;  %v1160_v55 = vadd.f32 1.0, %v761_v39  ;;  %v317_v56 = vadd.f32 6.0, %v301_v42  ;;  %v490_v58 = vand.u32 2147483647, %v1131_v31 }
 0x154   :  { %v534_v40 = vsel %vm533_vm10, %v749_v13, %v530_v25  ;;  %v559_v41 = vmul.f32 %v755_v22, %v558_v37  ;;  %768 = vrcp.f32 %v1146_v45  ;;  %v492_v59 = vand.u32 2147483648, %v1131_v31 }
 0x155   :  { %v763_v43 = vpop.eup %762  ;;  %v539_v44 = vsel %vm1133_vm9, %v538_v33, %v534_v40  ;;  %vm486_vm2 = vweird.f32 %v1131_v31  ;;  %vm606_vm3 = vweird.f32 %v1137_v35  ;;  %v610_v1 = vand.u32 2147483647, %v1137_v35 }
 0x156   :  { %641 = vst.msk [vmem:[%s1233_s5 + $0x48] sm:$0xff] %vm631_vm5, %v539_v44  ;;  %v560_v46 = vadd.f32 %v755_v22, %v559_v41  ;;  %v437_v49 = vmul.f32 %v763_v43, %v1127_v19  ;;  %vm442_vm1 = vweird.f32 %v763_v43  ;;  %770 = vrcp.f32 %v1160_v55 }
 0x157   :  { %v765_v52 = vpop.eup %764  ;;  %v612_v4 = vand.u32 2147483648, %v1137_v35  ;;  %v340_v5 = vmul.f32 %v957_v6, %v317_v56  ;;  %vm443_vm4 = vmor %vm441_vm15, %vm442_vm1  ;;  %vm1178_vm7 = vcmp.eq.f32.partialorder %v490_v58, 8.507059e+37  ;;  %v493_v9 = vor.u32 1.1754944e-38, %v492_v59 }
 0x158   :  { %v564_v53 = vsel %vm563_vm14, %v755_v22, %v560_v46  ;;  %v438_v54 = vsub.f32 1.0, %v437_v49  ;;  %v482_v47 = vmul.f32 %v765_v52, %v1131_v31  ;;  %vm487_vm6 = vweird.f32 %v765_v52 }
 0x159   :  { %v767_v57 = vpop.eup %766  ;;  %v569_v23 = vsel %vm566_vm13, %v568_v48, %v564_v53  ;;  %vm1185_vm9 = vcmp.eq.f32.partialorder %v610_v1, 8.507059e+37  ;;  %v369_v14 = vmul.f32 1.442695, %v340_v5  ;;  %vm488_vm10 = vmor %vm486_vm2, %vm487_vm6  ;;  %v613_v16 = vor.u32 1.1754944e-38, %v612_v4 }
 0x15a   :  { %643 = vst.msk [vmem:[%s1233_s5 + $0x58] sm:$0xff] %vm631_vm5, %v569_v23  ;;  %v439_v60 = vmul.f32 %v763_v43, %v438_v54  ;;  %v602_v62 = vmul.f32 %v767_v57, %v1137_v35  ;;  %v483_v63 = vsub.f32 1.0, %v482_v47  ;;  %v769_v29 = vpop.eup %768  ;;  %vm607_vm8 = vweird.f32 %v767_v57 }
 0x15b   :  { %v497_v12 = vmul.f32 %v769_v29, %v1146_v45  ;;  %v505_v18 = vand.u32 2147483647, %v1146_v45  ;;  %vm608_vm11 = vmor %vm606_vm3, %vm607_vm8  ;;  %vm502_vm12 = vweird.f32 %v769_v29  ;;  %v507_v21 = vand.u32 2147483648, %v1146_v45 }
 0x15c   :  { %v440_v3 = vadd.f32 %v763_v43, %v439_v60  ;;  %v603_v61 = vsub.f32 1.0, %v602_v62  ;;  %v484_v7 = vmul.f32 %v765_v52, %v483_v63  ;;  %v771_v19 = vpop.eup %770  ;;  %772 = vpow2.f32 %v369_v14 }
 0x15d   :  { %v498_v17 = vsub.f32 1.0, %v497_v12  ;;  %v617_v27 = vmul.f32 %v771_v19, %v1160_v55  ;;  %vm501_vm13 = vweird.f32 %v1146_v45  ;;  %vm506_vm15 = vcmp.eq.f32.partialorder %v505_v18, 8.507059e+37 }
 0x15e   :  { %v444_v2 = vsel %vm443_vm4, %v763_v43, %v440_v3  ;;  %v604_v10 = vmul.f32 %v767_v57, %v603_v61  ;;  %v485_v6 = vadd.f32 %v765_v52, %v484_v7  ;;  %vm503_vm14 = vmor %vm501_vm13, %vm502_vm12  ;;  %v508_v33 = vor.u32 1.1754944e-38, %v507_v21 }
 0x15f   :  { %v449_v13 = vsel %vm1155_vm0, %v448_v51, %v444_v2  ;;  %v499_v26 = vmul.f32 %v769_v29, %v498_v17  ;;  %v618_v32 = vsub.f32 1.0, %v617_v27  ;;  %vm621_vm0 = vweird.f32 %v1160_v55 }
 0x160   :  { %635 = vst.msk [vmem:[%s1233_s5 + $0x18] sm:$0xff] %vm631_vm5, %v449_v13  ;;  %v605_v15 = vadd.f32 %v767_v57, %v604_v10  ;;  %v489_v20 = vsel %vm488_vm10, %v765_v52, %v485_v6  ;;  %v627_v34 = vand.u32 2147483648, %v1160_v55  ;;  %vm622_vm1 = vweird.f32 %v771_v19 }
 0x161   :  { %v494_v22 = vsel %vm1178_vm7, %v493_v9, %v489_v20  ;;  %v500_v31 = vadd.f32 %v769_v29, %v499_v26  ;;  %v619_v36 = vmul.f32 %v771_v19, %v618_v32  ;;  %v625_v25 = vand.u32 2147483647, %v1160_v55  ;;  %vm623_vm2 = vmor %vm621_vm0, %vm622_vm1 }
 0x162   :  { %v609_v24 = vsel %vm608_vm11, %v767_v57, %v605_v15  ;;  %638 = vst.msk [vmem:[%s1233_s5 + $0x30] sm:$0xff] %vm631_vm5, %v494_v22  ;;  %v773_v37 = vpop.eup %772  ;;  %v628_v39 = vor.u32 1.1754944e-38, %v627_v34 }
 0x163   :  { %v614_v28 = vsel %vm1185_vm9, %v613_v16, %v609_v24  ;;  %v504_v35 = vsel %vm503_vm14, %v769_v29, %v500_v31  ;;  %v620_v0 = vadd.f32 %v771_v19, %v619_v36  ;;  %v388_v30 = vadd.f32 1.0, %v773_v37 }
 0x164   :  { %646 = vst.msk [vmem:[%s1233_s5 + $0x70] sm:$0xff] %vm631_vm5, %v614_v28  ;;  %v509_v38 = vsel %vm506_vm15, %v508_v33, %v504_v35  ;;  %vm626_vm3 = vcmp.eq.f32.partialorder %v625_v25, 8.507059e+37 }
 0x165   :  { %639 = vst.msk [vmem:[%s1233_s5 + $0x38] sm:$0xff] %vm631_vm5, %v509_v38  ;;  %v624_v40 = vsel %vm623_vm2, %v771_v19, %v620_v0  ;;  %774 = vrcp.f32 %v388_v30  ;;  %v597_v45 = vand.u32 2147483648, %v388_v30  ;;  %v595_v48 = vand.u32 2147483647, %v388_v30 }
 0x166   :  { %v629_v41 = vsel %vm626_vm3, %v628_v39, %v624_v40  ;;  %vm591_vm6 = vweird.f32 %v388_v30 }
 0x167   :  { %647 = vst.msk [vmem:[%s1233_s5 + $0x78] sm:$0xff] %vm631_vm5, %v629_v41  ;;  %v598_v50 = vor.u32 1.1754944e-38, %v597_v45  ;;  %vm596_vm8 = vcmp.eq.f32.partialorder %v595_v48, 8.507059e+37 }
 0x16b   :  { %v775_v42 = vpop.eup %774 }
 0x16c   :  { %v587_v43 = vmul.f32 %v775_v42, %v388_v30  ;;  %vm592_vm4 = vweird.f32 %v775_v42 }
 0x16d   :  { %vm593_vm7 = vmor %vm591_vm6, %vm592_vm4 }
 0x16e   :  { %v588_v44 = vsub.f32 1.0, %v587_v43 }
 0x170   :  { %v589_v46 = vmul.f32 %v775_v42, %v588_v44 }
 0x172   :  { %v590_v49 = vadd.f32 %v775_v42, %v589_v46 }
 0x174   :  { %v594_v51 = vsel %vm593_vm7, %v775_v42, %v590_v49 }
 0x175   :  { %v599_v52 = vsel %vm596_vm8, %v598_v50, %v594_v51 }
 0x176   :  { %645 = vst.msk [vmem:[%s1233_s5 + $0x68] sm:$0xff] %vm631_vm5, %v599_v52 }

</bundles_post_ra>
